<compile_context>
chip_gen: v7x
topology: tpu7x:2x2x1
jax: 0.10.0
libtpu: 0.0.40
codegen_flags: <defaults>
</compile_context>

<pallas_src>
import numpy as np
import jax
import jax.numpy as jnp
from jax import lax
from jax.experimental import pallas as pl
from jax.experimental.pallas import tpu as pltpu


_NEG_INF = -1e30          # finite "-inf" (avoids inf-inf NaNs in flash rescaling)
_ATTN_TQ_TARGET = 256     # q-tile rows target
_ATTN_TKV_TARGET = 512    # kv-tile rows target


def _vmem_limit_bytes():
    """Per-generation scoped-VMEM budget with ~1/8 headroom for compiler scratch."""
    cap = None
    try:
        cap = int(pltpu.get_tpu_info().vmem_capacity_bytes)
    except Exception:
        cap = None
    if not cap or cap <= 0:
        cap = 64 * 1024 * 1024
    return int(cap - cap // 8)   # ~112 MiB on v5e/v6e, ~56 MiB on v7x


_VMEM_LIMIT = _vmem_limit_bytes()


def _pick_tile(dim, target, align):
    """Largest multiple of `align` that divides `dim` and is <= target, else full dim."""
    if dim <= target:
        return dim
    t = (min(target, dim) // align) * align
    while t >= align:
        if dim % t == 0:
            return t
        t -= align
    return dim


# ----------------------------- tiled linear -----------------------------

def _make_linear_kernel(mxu_dtype):
    def kernel(x_ref, w_ref, b_ref, o_ref, acc_ref):
        @pl.when(pl.program_id(2) == 0)
        def _():
            acc_ref[...] = jnp.zeros_like(acc_ref)

        # MXU matmul on (possibly bf16) operands, f32 accumulation.
        acc_ref[...] += jnp.dot(x_ref[...].astype(mxu_dtype),
                                w_ref[...].astype(mxu_dtype),
                                preferred_element_type=jnp.float32)

        @pl.when(pl.program_id(2) == pl.num_programs(2) - 1)
        def _():
            o_ref[...] = (acc_ref[...]
                          + b_ref[...].astype(jnp.float32)).astype(o_ref.dtype)

    return kernel


def pallas_linear(x2d, w_in_out, bias, *, mxu_dtype=jnp.float32,
                  tm=256, tn=512, tk=512):
    """y = x @ W + b.  x2d: (R, Din), W: (Din, Dout), bias: (Dout,) -> (R, Dout)."""
    R, Din = x2d.shape
    Dout = w_in_out.shape[1]
    row_align = 16 if np.dtype(mxu_dtype).itemsize < 4 else 8   # bf16 packs 16 rows
    tm = _pick_tile(R, tm, row_align)
    tn = _pick_tile(Dout, tn, 128)
    tk = _pick_tile(Din, tk, 128)
    b2d = bias.reshape(1, Dout)
    return pl.pallas_call(
        _make_linear_kernel(mxu_dtype),
        out_shape=jax.ShapeDtypeStruct((R, Dout), x2d.dtype),
        grid=(R // tm, Dout // tn, Din // tk),
        in_specs=[
            pl.BlockSpec((tm, tk), lambda i, j, k: (i, k)),
            pl.BlockSpec((tk, tn), lambda i, j, k: (k, j)),
            pl.BlockSpec((1, tn), lambda i, j, k: (0, j)),
        ],
        out_specs=pl.BlockSpec((tm, tn), lambda i, j, k: (i, j)),
        scratch_shapes=[pltpu.VMEM((tm, tn), jnp.float32)],
        compiler_params=pltpu.CompilerParams(
            dimension_semantics=("parallel", "parallel", "arbitrary"),
            vmem_limit_bytes=_VMEM_LIMIT),
    )(x2d, w_in_out, b2d)


# --------------------------- attention kernel ---------------------------

def _make_flash_attn_kernel(n_heads, d_k, n_mem, mxu_dtype):
    """Flash-style memory-attention body for grid (batch, q-tile, kv-tile).

    Refs (squeezed): q (tq, H, d_k) resident across kv-tiles, k/v (tkv, H, d_k)
    streamed, optional memory slots (m, H, d_k) fetched once, output
    (tq, H*d_k) lane-dense and resident across kv-tiles.  Scratch (f32):
    per-head running max / denom (tq, H), un-normalized accumulator
    (tq, H*d_k).  Heads are statically unrolled so every column offset is
    static (one dense slab store, no dynamic lane indexing).
    """

    def kernel(*refs):
        if n_mem > 0:
            q_ref, k_ref, v_ref, mk_ref, mv_ref, o_ref, m_scr, l_scr, acc_scr = refs
        else:
            q_ref, k_ref, v_ref, o_ref, m_scr, l_scr, acc_scr = refs

        ki = pl.program_id(2)

        @pl.when(ki == 0)
        def _init():
            m_scr[...] = jnp.full_like(m_scr, _NEG_INF)
            l_scr[...] = jnp.zeros_like(l_scr)
            acc_scr[...] = jnp.zeros_like(acc_scr)

        def online_softmax_step(hh, s, val):
            """One online-softmax (flash) update for head hh; s: (tq, n) f32."""
            cols = slice(hh * d_k, (hh + 1) * d_k)
            hcol = slice(hh, hh + 1)
            m_prev = m_scr[:, hcol]                                     # (tq, 1)
            m_new = jnp.maximum(m_prev, jnp.max(s, axis=-1, keepdims=True))
            alpha = jnp.exp(m_prev - m_new)                             # EUP
            p = jnp.exp(s - m_new)                                      # (tq, n)
            l_scr[:, hcol] = alpha * l_scr[:, hcol] + jnp.sum(p, -1, keepdims=True)
            acc_scr[:, cols] = alpha * acc_scr[:, cols] + jnp.dot(
                p.astype(val.dtype), val, preferred_element_type=jnp.float32)
            m_scr[:, hcol] = m_new

        # One streamed KV tile: QK^T (no materialized transpose) + flash update
        # per head.  1/sqrt(d_k) is already folded into W_q at init.
        for hh in range(n_heads):
            qh = q_ref[:, hh, :].astype(mxu_dtype)          # (tq, d_k)
            kh = k_ref[:, hh, :].astype(mxu_dtype)          # (tkv, d_k)
            s = lax.dot_general(qh, kh, (((1,), (1,)), ((), ())),
                                preferred_element_type=jnp.float32)     # (tq, tkv)
            online_softmax_step(hh, s, v_ref[:, hh, :].astype(mxu_dtype))

        @pl.when(ki == pl.num_programs(2) - 1)
        def _finalize():
            for hh in range(n_heads):
                cols = slice(hh * d_k, (hh + 1) * d_k)
                hcol = slice(hh, hh + 1)
                if n_mem > 0:
                    # Memory slots = one extra online-softmax step (two-piece
                    # softmax): no concat / re-slice of the score tensor.
                    qh = q_ref[:, hh, :].astype(mxu_dtype)
                    mkh = mk_ref[:, hh, :].astype(mxu_dtype)   # pre-scaled sqrt(d_k)
                    s_mem = lax.dot_general(qh, mkh, (((1,), (1,)), ((), ())),
                                            preferred_element_type=jnp.float32)
                    online_softmax_step(hh, s_mem,
                                        mv_ref[:, hh, :].astype(mxu_dtype))
                # Normalize: EUP approx reciprocal + one Newton step (~f32-exact).
                l = l_scr[:, hcol]
                r = pl.reciprocal(l, approx=True)
                r = r * (2.0 - l * r)
                acc_scr[:, cols] = acc_scr[:, cols] * r
            # Single lane-dense (tq, d_model) store; heads already merged.
            o_ref[...] = acc_scr[...].astype(o_ref.dtype)

    return kernel


def _flash_attention_call(inputs, make_specs, *, B, nq, nk, H, dk, n_mem,
                          m_k_h, m_v_h, out_dtype, mxu_dtype):
    d_model = H * dk
    tq = _pick_tile(nq, _ATTN_TQ_TARGET, 8)
    tkv = _pick_tile(nk, _ATTN_TKV_TARGET, 8)

    in_specs = make_specs(tq, tkv)
    inputs = list(inputs)
    if n_mem > 0:
        # Memory slots: constant block index => fetched once, broadcast over grid.
        in_specs += [pl.BlockSpec((n_mem, H, dk), lambda b, qi, ki: (0, 0, 0)),
                     pl.BlockSpec((n_mem, H, dk), lambda b, qi, ki: (0, 0, 0))]
        inputs += [m_k_h, m_v_h]

    return pl.pallas_call(
        _make_flash_attn_kernel(H, dk, n_mem, mxu_dtype),
        out_shape=jax.ShapeDtypeStruct((B, nq, d_model), out_dtype),
        grid=(B, nq // tq, nk // tkv),
        in_specs=in_specs,
        out_specs=pl.BlockSpec((None, tq, d_model), lambda b, qi, ki: (b, qi, 0)),
        scratch_shapes=[
            pltpu.VMEM((tq, H), jnp.float32),          # running max per head
            pltpu.VMEM((tq, H), jnp.float32),          # running denom per head
            pltpu.VMEM((tq, d_model), jnp.float32),    # un-normalized output acc
        ],
        compiler_params=pltpu.CompilerParams(
            dimension_semantics=("parallel", "parallel", "arbitrary"),
            vmem_limit_bytes=_VMEM_LIMIT),
    )(*inputs)


def pallas_mem_attention(q_h, k_h, v_h, m_k_h, m_v_h, n_mem, mxu_dtype):
    """q_h: (B, nq, H, d_k); k_h / v_h: (B, nk, H, d_k) -> (B, nq, H*d_k)."""
    B, nq, H, dk = q_h.shape
    nk = k_h.shape[1]

    def make_specs(tq, tkv):
        return [pl.BlockSpec((None, tq, H, dk), lambda b, qi, ki: (b, qi, 0, 0)),
                pl.BlockSpec((None, tkv, H, dk), lambda b, qi, ki: (b, ki, 0, 0)),
                pl.BlockSpec((None, tkv, H, dk), lambda b, qi, ki: (b, ki, 0, 0))]

    return _flash_attention_call([q_h, k_h, v_h], make_specs, B=B, nq=nq, nk=nk,
                                 H=H, dk=dk, n_mem=n_mem, m_k_h=m_k_h, m_v_h=m_v_h,
                                 out_dtype=q_h.dtype, mxu_dtype=mxu_dtype)


def pallas_mem_attention_fused_qkv(qkv5, m_k_h, m_v_h, n_mem, mxu_dtype):
    """qkv5: (B, n, 3, H, d_k) fused projection; roles selected by index_map."""
    B, n, _, H, dk = qkv5.shape

    def make_specs(tq, tkv):
        return [pl.BlockSpec((None, tq, None, H, dk), lambda b, qi, ki: (b, qi, 0, 0, 0)),
                pl.BlockSpec((None, tkv, None, H, dk), lambda b, qi, ki: (b, ki, 1, 0, 0)),
                pl.BlockSpec((None, tkv, None, H, dk), lambda b, qi, ki: (b, ki, 2, 0, 0))]

    return _flash_attention_call([qkv5, qkv5, qkv5], make_specs, B=B, nq=n, nk=n,
                                 H=H, dk=dk, n_mem=n_mem, m_k_h=m_k_h, m_v_h=m_v_h,
                                 out_dtype=qkv5.dtype, mxu_dtype=mxu_dtype)


def pallas_mem_attention_fused_kv(q_h, kv5, m_k_h, m_v_h, n_mem, mxu_dtype):
    """q_h: (B, nq, H, d_k); kv5: (B, nk, 2, H, d_k) fused K|V projection."""
    B, nq, H, dk = q_h.shape
    nk = kv5.shape[1]

    def make_specs(tq, tkv):
        return [pl.BlockSpec((None, tq, H, dk), lambda b, qi, ki: (b, qi, 0, 0)),
                pl.BlockSpec((None, tkv, None, H, dk), lambda b, qi, ki: (b, ki, 0, 0, 0)),
                pl.BlockSpec((None, tkv, None, H, dk), lambda b, qi, ki: (b, ki, 1, 0, 0))]

    return _flash_attention_call([q_h, kv5, kv5], make_specs, B=B, nq=nq, nk=nk,
                                 H=H, dk=dk, n_mem=n_mem, m_k_h=m_k_h, m_v_h=m_v_h,
                                 out_dtype=q_h.dtype, mxu_dtype=mxu_dtype)


# ----------------------------- module wrapper -----------------------------

class MemoryAttentionParams:
    """Deterministic parameter init mirroring the PyTorch module's __init__.

    Raw parameters (w_q/w_k/w_v/w_o, m_k/m_v) mirror the PyTorch module; the
    kernel-ready derived tensors fold all constant scalings at init time:
      * w_q_s / b_q_s : fc_q with 1/sqrt(d_k) folded in
      * w_qkv / b_qkv : fused Q|K|V projection (self-attention fast path)
      * w_kv  / b_kv  : fused K|V projection (k is v fast path)
      * m_k_h         : memory keys   * sqrt(d_k),        head-split (m, H, d_k)
      * m_v_h         : memory values * sqrt(n_memories), head-split (m, H, d_k)
    """

    def __init__(self, key, d_model, n_heads, n_memories, mxu_dtype=jnp.bfloat16):
        self.d_model = d_model
        self.n_heads = n_heads
        self.n_memories = n_memories
        self.d_k = d_model // n_heads
        self.mxu_dtype = mxu_dtype

        keys = jax.random.split(key, 6)

        def xavier(k, fan_out, fan_in):
            a = np.sqrt(6.0 / (fan_in + fan_out))
            return jax.random.uniform(k, (fan_out, fan_in), jnp.float32, -a, a)

        # PyTorch Linear weight is (out, in); store transposed (in, out) for x @ W.
        self.w_q = xavier(keys[0], d_model, d_model).T
        self.w_k = xavier(keys[1], d_model, d_model).T
        self.w_v = xavier(keys[2], d_model, d_model).T
        self.w_o = xavier(keys[3], d_model, d_model).T
        self.b_q = jnp.zeros((d_model,), jnp.float32)
        self.b_k = jnp.zeros((d_model,), jnp.float32)
        self.b_v = jnp.zeros((d_model,), jnp.float32)
        self.b_o = jnp.zeros((d_model,), jnp.float32)

        inv_sqrt_dk = 1.0 / np.sqrt(self.d_k)
        self.w_q_s = self.w_q * inv_sqrt_dk
        self.b_q_s = self.b_q * inv_sqrt_dk

        self.w_qkv = jnp.concatenate([self.w_q_s, self.w_k, self.w_v], axis=1)
        self.b_qkv = jnp.concatenate([self.b_q_s, self.b_k, self.b_v], axis=0)
        self.w_kv = jnp.concatenate([self.w_k, self.w_v], axis=1)
        self.b_kv = jnp.concatenate([self.b_k, self.b_v], axis=0)

        if n_memories > 0:
            self.m_k = (1.0 / self.d_k) * jax.random.normal(
                keys[4], (1, n_memories, d_model), jnp.float32)
            self.m_v = (1.0 / n_memories) * jax.random.normal(
                keys[5], (1, n_memories, d_model), jnp.float32)
            self.m_k_h = (self.m_k * np.sqrt(self.d_k)).reshape(
                n_memories, n_heads, self.d_k)
            self.m_v_h = (self.m_v * np.sqrt(n_memories)).reshape(
                n_memories, n_heads, self.d_k)
        else:
            self.m_k = self.m_v = self.m_k_h = self.m_v_h = None


def memory_attention_forward(params, q, k, v):
    """MemoryAttention forward (attention_mask/attention_weights=None, eval dropout).

    Note: fused-projection fast paths dispatch on Python object identity; under
    jit/vmap identical tensors may be distinct objects and silently take the
    (numerically identical, slightly slower) general 3-launch path.
    """
    b_s, nq, d_model = q.shape
    nk = k.shape[1]
    h, d_k, m = params.n_heads, params.d_k, params.n_memories
    dt = params.mxu_dtype

    if (q is k) and (k is v):
        # Self-attention: one fused (d_model, 3*d_model) projection launch;
        # attention reads q/k/v roles straight out of the fused output via
        # strided BlockSpec index_maps (no XLA slice/transpose in between).
        qkv = pallas_linear(q.reshape(b_s * nq, d_model),
                            params.w_qkv, params.b_qkv, mxu_dtype=dt)
        qkv5 = qkv.reshape(b_s, nq, 3, h, d_k)              # metadata-only
        o = pallas_mem_attention_fused_qkv(qkv5, params.m_k_h, params.m_v_h, m, dt)
    elif k is v:
        # Encoder-memory cross-attention (k is v): fuse K and V projections
        # into one (d_model, 2*d_model) launch (k read once from HBM).
        q_p = pallas_linear(q.reshape(b_s * nq, d_model),
                            params.w_q_s, params.b_q_s, mxu_dtype=dt)
        kv = pallas_linear(k.reshape(b_s * nk, d_model),
                           params.w_kv, params.b_kv, mxu_dtype=dt)
        o = pallas_mem_attention_fused_kv(q_p.reshape(b_s, nq, h, d_k),
                                          kv.reshape(b_s, nk, 2, h, d_k),
                                          params.m_k_h, params.m_v_h, m, dt)
    else:
        q_p = pallas_linear(q.reshape(b_s * nq, d_model),
                            params.w_q_s, params.b_q_s, mxu_dtype=dt)
        k_p = pallas_linear(k.reshape(b_s * nk, d_model),
                            params.w_k, params.b_k, mxu_dtype=dt)
        v_p = pallas_linear(v.reshape(b_s * nk, d_model),
                            params.w_v, params.b_v, mxu_dtype=dt)
        o = pallas_mem_attention(q_p.reshape(b_s, nq, h, d_k),
                                 k_p.reshape(b_s, nk, h, d_k),
                                 v_p.reshape(b_s, nk, h, d_k),
                                 params.m_k_h, params.m_v_h, m, dt)

    # o: (b_s, nq, d_model), heads already merged lane-dense by the kernel.
    out = pallas_linear(o.reshape(b_s * nq, d_model),
                        params.w_o, params.b_o, mxu_dtype=dt)
    return out.reshape(b_s, nq, d_model)


# Pure-JAX reference mirroring the PyTorch module (uses raw, unscaled params).
def memory_attention_reference(params, q, k, v):
    b_s, nq, d_model = q.shape
    nk = k.shape[1]
    h, d_k, m = params.n_heads, params.d_k, params.n_memories
    qp = q @ params.w_q + params.b_q
    kp = k @ params.w_k + params.b_k
    vp = v @ params.w_v + params.b_v
    if m > 0:
        m_k = jnp.broadcast_to(params.m_k, (b_s, m, d_model)) * np.sqrt(d_k)
        m_v = jnp.broadcast_to(params.m_v, (b_s, m, d_model)) * np.sqrt(m)
        kp = jnp.concatenate([kp, m_k], axis=1)
        vp = jnp.concatenate([vp, m_v], axis=1)
    nkt = kp.shape[1]
    qh = qp.reshape(b_s, nq, h, d_k).transpose(0, 2, 1, 3)
    kh = kp.reshape(b_s, nkt, h, d_k).transpose(0, 2, 1, 3)
    vh = vp.reshape(b_s, nkt, h, d_k).transpose(0, 2, 1, 3)
    s = jnp.einsum('bhqd,bhkd->bhqk', qh, kh) / np.sqrt(d_k)
    p = jax.nn.softmax(s, axis=-1)
    oh = jnp.einsum('bhqk,bhkd->bhqd', p, vh)
    o = oh.transpose(0, 2, 1, 3).reshape(b_s, nq, d_model)
    return o @ params.w_o + params.b_o


if __name__ == "__main__":
    d_model, n_heads, n_memories = 32, 4, 8
    b_s, nq, nk = 2, 8, 8

    root = jax.random.PRNGKey(0)
    kp, kq, kk, kv = jax.random.split(root, 4)
    q = jax.random.normal(kq, (b_s, nq, d_model), jnp.float32)
    k = jax.random.normal(kk, (b_s, nk, d_model), jnp.float32)
    v = jax.random.normal(kv, (b_s, nk, d_model), jnp.float32)

    # ----- exact-precision path (f32 MXU operands): tight correctness checks -----
    p32 = MemoryAttentionParams(kp, d_model, n_heads, n_memories,
                                mxu_dtype=jnp.float32)

    ref = memory_attention_reference(p32, q, k, v)
    out = jax.block_until_ready(memory_attention_forward(p32, q, k, v))
    np.testing.assert_allclose(np.asarray(out), np.asarray(ref), rtol=2e-3, atol=2e-3)

    out_kv = jax.block_until_ready(memory_attention_forward(p32, q, k, k))
    ref_kv = memory_attention_reference(p32, q, k, k)
    np.testing.assert_allclose(np.asarray(out_kv), np.asarray(ref_kv), rtol=2e-3, atol=2e-3)

    out_sa = jax.block_until_ready(memory_attention_forward(p32, q, q, q))
    ref_sa = memory_attention_reference(p32, q, q, q)
    np.testing.assert_allclose(np.asarray(out_sa), np.asarray(ref_sa), rtol=2e-3, atol=2e-3)

    p32_nm = MemoryAttentionParams(kp, d_model, n_heads, 0, mxu_dtype=jnp.float32)
    out_nm = jax.block_until_ready(memory_attention_forward(p32_nm, q, k, v))
    ref_nm = memory_attention_reference(p32_nm, q, k, v)
    np.testing.assert_allclose(np.asarray(out_nm), np.asarray(ref_nm), rtol=2e-3, atol=2e-3)

    # ----- production path (default bf16 MXU operands, f32 accumulation) -----
    # bf16 operand rounding (~0.4% rel per operand) only; loose tolerance.
    pbf = MemoryAttentionParams(kp, d_model, n_heads, n_memories)
    out_bf = jax.block_until_ready(memory_attention_forward(pbf, q, k, v))
    np.testing.assert_allclose(np.asarray(out_bf), np.asarray(ref), rtol=1e-1, atol=1e-1)

    print("KERNEL_OK")
</pallas_src>

<mosaic_0001>
module attributes {stable_mosaic.version = 11 : i64} {
  func.func @kernel(%arg0: i32, %arg1: i32, %arg2: i32, %arg3: memref<16x32xf32, #tpu.memory_space<vmem>>, %arg4: memref<32x32xf32, #tpu.memory_space<vmem>>, %arg5: memref<1x32xf32, #tpu.memory_space<vmem>>, %arg6: memref<16x32xf32, #tpu.memory_space<vmem>>, %arg7: memref<16x32xf32, #tpu.memory_space<vmem>>) attributes {dimension_semantics = [#tpu.dimension_semantics<parallel>, #tpu.dimension_semantics<parallel>, #tpu.dimension_semantics<arbitrary>], iteration_bounds = array<i64: 1, 1, 1>, scalar_prefetch = 0 : i64, scratch_operands = 1 : i64, tpu.core_type = #tpu.core_type<tc>, window_params = [{transform_indices = @transform_0, window_bounds = array<i64: 16, 32>}, {transform_indices = @transform_1, window_bounds = array<i64: 32, 32>}, {transform_indices = @transform_2, window_bounds = array<i64: 1, 32>}, {transform_indices = @transform_3, window_bounds = array<i64: 16, 32>}]} {
    %c0_i32 = arith.constant 0 : i32
    %0 = arith.cmpi eq, %arg2, %c0_i32 : i32
    %1 = arith.extui %0 : i1 to i32
    %c0_i32_0 = arith.constant 0 : i32
    %2 = arith.cmpi ne, %1, %c0_i32_0 : i32
    scf.if %2 {
      %cst_10 = arith.constant 0.000000e+00 : f32
      %12 = vector.broadcast %cst_10 : f32 to vector<16x32xf32>
      %c0_11 = arith.constant 0 : index
      %c0_12 = arith.constant 0 : index
      %13 = vector.load %arg7[%c0_11, %c0_12] : memref<16x32xf32, #tpu.memory_space<vmem>>, vector<16x32xf32>
      tpu.vector_store %arg7[%c0_11, %c0_12], %12 {strides = array<i32>} : memref<16x32xf32, #tpu.memory_space<vmem>>, vector<16x32xf32>,
    } else {
    }
    %c0 = arith.constant 0 : index
    %c0_1 = arith.constant 0 : index
    %3 = vector.load %arg7[%c0, %c0_1] : memref<16x32xf32, #tpu.memory_space<vmem>>, vector<16x32xf32>
    %c0_2 = arith.constant 0 : index
    %c0_3 = arith.constant 0 : index
    %4 = vector.load %arg3[%c0_2, %c0_3] : memref<16x32xf32, #tpu.memory_space<vmem>>, vector<16x32xf32>
    %c0_4 = arith.constant 0 : index
    %c0_5 = arith.constant 0 : index
    %5 = vector.load %arg4[%c0_4, %c0_5] : memref<32x32xf32, #tpu.memory_space<vmem>>, vector<32x32xf32>
    %cst = arith.constant dense<0.000000e+00> : vector<16x32xf32>
    %6 = tpu.matmul %4, %5, %cst {dimension_numbers = #tpu.dot_dimension_numbers<[1], [0], [0], [1], [0, 0, 1, 1], [], []>} : vector<16x32xf32>, vector<32x32xf32>, vector<16x32xf32> -> vector<16x32xf32>
    %7 = arith.addf %3, %6 : vector<16x32xf32>
    %c0_6 = arith.constant 0 : index
    %c0_7 = arith.constant 0 : index
    %8 = vector.load %arg7[%c0_6, %c0_7] : memref<16x32xf32, #tpu.memory_space<vmem>>, vector<16x32xf32>
    tpu.vector_store %arg7[%c0_6, %c0_7], %7 {strides = array<i32>} : memref<16x32xf32, #tpu.memory_space<vmem>>, vector<16x32xf32>,
    %c0_i32_8 = arith.constant 0 : i32
    %9 = arith.cmpi eq, %arg2, %c0_i32_8 : i32
    %10 = arith.extui %9 : i1 to i32
    %c0_i32_9 = arith.constant 0 : i32
    %11 = arith.cmpi ne, %10, %c0_i32_9 : i32
    scf.if %11 {
      %c0_10 = arith.constant 0 : index
      %c0_11 = arith.constant 0 : index
      %12 = vector.load %arg7[%c0_10, %c0_11] : memref<16x32xf32, #tpu.memory_space<vmem>>, vector<16x32xf32>
      %c0_12 = arith.constant 0 : index
      %c0_13 = arith.constant 0 : index
      %13 = vector.load %arg5[%c0_12, %c0_13] : memref<1x32xf32, #tpu.memory_space<vmem>>, vector<1x32xf32>
      %14 = vector.broadcast %13 : vector<1x32xf32> to vector<16x32xf32>
      %15 = arith.addf %12, %14 : vector<16x32xf32>
      %c0_14 = arith.constant 0 : index
      %c0_15 = arith.constant 0 : index
      %16 = vector.load %arg6[%c0_14, %c0_15] : memref<16x32xf32, #tpu.memory_space<vmem>>, vector<16x32xf32>
      tpu.vector_store %arg6[%c0_14, %c0_15], %15 {strides = array<i32>} : memref<16x32xf32, #tpu.memory_space<vmem>>, vector<16x32xf32>,
    } else {
    }
    return
  }
  func.func @transform_0(%arg0: i32, %arg1: i32, %arg2: i32) -> (i32, i32) {
    %c0_i32 = arith.constant 0 : i32
    return %arg0, %arg2 : i32, i32
  }
  func.func @transform_1(%arg0: i32, %arg1: i32, %arg2: i32) -> (i32, i32) {
    %c0_i32 = arith.constant 0 : i32
    return %arg2, %arg1 : i32, i32
  }
  func.func @transform_2(%arg0: i32, %arg1: i32, %arg2: i32) -> (i32, i32) {
    %c0_i32 = arith.constant 0 : i32
    %c0_i32_0 = arith.constant 0 : i32
    return %c0_i32, %arg1 : i32, i32
  }
  func.func @transform_3(%arg0: i32, %arg1: i32, %arg2: i32) -> (i32, i32) {
    %c0_i32 = arith.constant 0 : i32
    return %arg0, %arg1 : i32, i32
  }
}

</mosaic_0001>

<bundles_post_ra>
// kernel: tpu_custom_call.1
= control target key start
LH: loop header
LB: loop body
LE: loop exit
PB: predicated region body
PF: predicated region fallthrough
CT: control target
= control target key end

     0   :  { %8 = vsyncpa [#allocation4], 0  ;;  %s366_s0 = inlined_call_operand.hbm [shape: f32[16,32], index: 0, kind: input, shape index: {}]   ;;  %s367_s1 = inlined_call_operand.hbm [shape: f32[32,32], index: 1, kind: input, shape index: {}]   ;;  %s368_s2 = inlined_call_operand.vmem [shape: f32[1,32], index: 2, kind: input, shape index: {}]   ;;  %s369_s3 = inlined_call_operand.hbm [shape: f32[16,32], index: 3, kind: output, shape index: {}]  }
   0x1   :  { %9 = vsyncpa [#allocation7], 0 }
   0x2   :  { %10 = vsyncpa [#allocation5], 0  ;;  %s284_s12 = smov [#allocation3]   ;;  %s212_s16 = scalar_lea.hbm %s366_s0, 256 }
   0x3   :  { %s16_s13 = sshll.u32 %s284_s12, 4  ;;  %p213_p0 = scmp.ne.s32.totalorder %s366_s0, %s212_s16  ;;  %s17_s13 = int_to_ptr.vmem [resolvable:$true] %s16_s13 }
   0x4   :  { %p216_p1 = scmp.lt.u32.totalorder %s212_s16, %s366_s0 }
   0x6   :  { %p218_p2 = pnand %p216_p1, %p213_p0 }
   0x8   :  { %221 = shalt.err (!%p218_p2)
}
   0x9   :  { %s222_s21 = scalar_lea.vmem %s17_s13, 256  ;;  %p227_p4 = scmp.lt.s32.totalorder %s17_s13, %s17_s13 }
   0xa   :  { %p223_p3 = scmp.ne.s32.totalorder %s17_s13, %s222_s21  ;;  %p228_p5 = scmp.lt.s32.totalorder %s222_s21, %s222_s21 }
   0xc   :  { %p229_p6 = por %p228_p5, %p227_p4 }
   0xe   :  { %p230_p7 = pnand %p229_p6, %p223_p3 }
  0x10   :  { %233 = shalt.err (!%p230_p7)
}
  0x11   :  { %s285_s22 = smov 128   ;;  %s286_s23 = smov 8  }
  0x12   :  { %22 = dma.hbm_to_vmem [thread:$0]  %s366_s0, 256, %s17_s13, [#allocation4], %s285_s22, %s285_s22, %s286_s23  }
  0x13   :  { %s287_s26 = smov [#allocation6]   ;;  %s234_s30 = scalar_lea.hbm %s367_s1, 512 }
  0x14   :  { %s28_s27 = sshll.u32 %s287_s26, 4  ;;  %p235_p8 = scmp.ne.s32.totalorder %s367_s1, %s234_s30  ;;  %s29_s27 = int_to_ptr.vmem [resolvable:$true] %s28_s27 }
  0x15   :  { %p238_p9 = scmp.lt.u32.totalorder %s234_s30, %s367_s1 }
  0x17   :  { %p240_p10 = pnand %p238_p9, %p235_p8 }
  0x19   :  { %243 = shalt.err (!%p240_p10)
}
  0x1a   :  { %s244_s8 = scalar_lea.vmem %s29_s27, 512  ;;  %p249_p12 = scmp.lt.s32.totalorder %s29_s27, %s29_s27 }
  0x1b   :  { %p245_p11 = scmp.ne.s32.totalorder %s29_s27, %s244_s8  ;;  %p250_p13 = scmp.lt.s32.totalorder %s244_s8, %s244_s8 }
  0x1d   :  { %p251_p0 = por %p250_p13, %p249_p12 }
  0x1f   :  { %p252_p1 = pnand %p251_p0, %p245_p11 }
  0x21   :  { %255 = shalt.err (!%p252_p1)
}
  0x22   :  { %34 = dma.hbm_to_vmem [thread:$0]  %s367_s1, 512, %s29_s27, [#allocation7], %s285_s22, %s285_s22, %s286_s23  }
  0x23   :  { %278 = dma.done.wait [#allocation4], 256  }
  0x24   :  { %279 = vsyncadd [#allocation4], 4294967040 }
  0x25   :  { %280 = dma.done.wait [#allocation7], 512  }
  0x26   :  { %281 = vsyncadd [#allocation7], 4294966784  ;;  %vm47_vm0 = vcmask 261120   ;;  %v288_v0 = vmov 0.0   ;;  %v54_v1 = vld [vmem:[#allocation6] sm:$0xff]  ;;  %v55_v2 = vld [vmem:[#allocation6 + $0x8] sm:$0xff] }
  0x27   :  { %49 = vst.msk [vmem:[#allocation2 + $0x8] sm:$0xff] %vm47_vm0, %v288_v0  ;;  %48 = vst.msk [vmem:[#allocation2] sm:$0xff] %vm47_vm0, %v288_v0  ;;  %v56_v3 = vld [vmem:[#allocation6 + $0x10] sm:$0xff]  ;;  %v198_v4 = vpack.c.bf16 %v55_v2, %v54_v1  ;;  %v57_v5 = vld [vmem:[#allocation6 + $0x18] sm:$0xff]  ;;  %s289_s11 = smov [#allocation8]  }
  0x28   :  { %v52_v6 = vld [vmem:[#allocation3] sm:$0xff]  ;;  %v202_v7 = vpack.c.bf16 %v57_v5, %v56_v3  ;;  %v53_v8 = vld [vmem:[#allocation3 + $0x8] sm:$0xff]  ;;  %v180_v15 = vld [vmem:[%s368_s2] ss:$0 sm:$0xff]  ;;  %s165_s12 = sshll.u32 %s289_s11, 4  ;;  %s166_s12 = int_to_ptr.vmem [resolvable:$true] %s165_s12 }
  0x29   :  { %195 = vmatprep.mubr.msk.f32.mxu0 %vm47_vm0, %v52_v6  ;;  %199 = vmatprep.subr.bf16.mxu0 %v198_v4  ;;  %s256_s13 = scalar_lea.vmem %s166_s12, 256  ;;  %p261_p3 = scmp.lt.s32.totalorder %s166_s12, %s166_s12 }
  0x2a   :  { %201 = vmatpush3.bf16.msra.mxu0 %v198_v4  ;;  %p257_p2 = scmp.ne.s32.totalorder %s166_s12, %s256_s13  ;;  %p262_p4 = scmp.lt.s32.totalorder %s256_s13, %s256_s13 }
  0x2b   :  { %203 = vmatprep.subr.bf16.mxu0 %v202_v7 }
  0x2c   :  { %p263_p5 = por %p262_p4, %p261_p3 }
  0x2e   :  { %205 = vmatpush3.bf16.msra.mxu0 %v202_v7  ;;  %v51_v9 = vld [vmem:[#allocation2 + $0x8] sm:$0xff]  ;;  %v50_v10 = vld [vmem:[#allocation2] sm:$0xff]  ;;  %p264_p6 = pnand %p263_p5, %p257_p2 }
  0x31   :  { %196 = vmatmul.mubr.msk.f32.vlgmr.msra.gmra.mrb[0].mxu0 %vm47_vm0, %v53_v8 }
 0x104   :  { %v197_v11 = vpop.f32.mrb[0].mxu0 }
 0x105   :  { %v141_v12 = vadd.f32 %v197_v11, %v51_v9  ;;  %v131_v13 = vpop.f32.mrb[1].mxu0 }
 0x106   :  { %v140_v14 = vadd.f32 %v131_v13, %v50_v10 }
 0x107   :  { %143 = vst.msk [vmem:[#allocation2 + $0x8] sm:$0xff] %vm47_vm0, %v141_v12 }
 0x108   :  { %142 = vst.msk [vmem:[#allocation2] sm:$0xff] %vm47_vm0, %v140_v14 }
 0x10e   :  { %v148_v16 = vld [vmem:[#allocation2 + $0x8] sm:$0xff] }
 0x10f   :  { %v147_v17 = vld [vmem:[#allocation2] sm:$0xff]  ;;  %v157_v18 = vadd.f32 %v180_v15, %v148_v16 }
 0x110   :  { %v156_v19 = vadd.f32 %v180_v15, %v147_v17 }
 0x111   :  { %159 = vst.msk [vmem:[#allocation8 + $0x8] sm:$0xff] %vm47_vm0, %v157_v18 }
 0x112   :  { %158 = vst.msk [vmem:[#allocation8] sm:$0xff] %vm47_vm0, %v156_v19 }
 0x113   :  { %267 = shalt.err (!%p264_p6)
}
 0x114   :  { %s268_s15 = scalar_lea.hbm %s369_s3, 256 }
 0x115   :  { %p269_p7 = scmp.ne.s32.totalorder %s369_s3, %s268_s15  ;;  %p272_p8 = scmp.lt.u32.totalorder %s268_s15, %s369_s3 }
 0x117   :  { %p274_p9 = pnand %p272_p8, %p269_p7 }
 0x119   :  { %277 = shalt.err (!%p274_p9)
}
 0x11a   :  { %171 = dma.vmem_to_hbm [thread:$0]  %s166_s12, 256, %s369_s3, [#allocation5], %s285_s22, %s285_s22, %s286_s23  }
 0x11b   :  { %282 = dma.done.wait [#allocation5], 256  }
 0x11c   :  { %283 = vsyncadd [#allocation5], 4294967040 }
 0x11d   :  { %175 = vsyncpa [#allocation4], 1 }
 0x11e   :  { %176 = vsyncpa [#allocation7], 1 }
 0x11f   :  { %177 = vsyncpa [#allocation5], 1 }

</bundles_post_ra>
